<compile_context>
chip_gen: v7x
topology: tpu7x:2x2x1
jax: 0.10.0
libtpu: 0.0.40
codegen_flags: <defaults>
</compile_context>

<pallas_src>
import jax
import jax.numpy as jnp
from jax import lax
from jax.experimental import pallas as pl
from jax.experimental.pallas import tpu as pltpu

EPS = 1e-5
LANES = 128
VMEM_LIMIT = 32 * 1024 * 1024   # safe scoped-VMEM limit on v5e / v6e / v7x


# ------------------------------ small helpers --------------------------------

def _round_up(n, m):
    return ((n + m - 1) // m) * m


def _pick_row_tile(rows, max_tile=512, mult=16):
    """Largest multiple-of-`mult` divisor of `rows` that is <= max_tile."""
    t = min(max_tile, rows)
    t -= t % mult
    while t >= mult:
        if rows % t == 0:
            return t
        t -= mult
    return rows            # fall back: single full-height block


def _row_spec(tile_r, cols):
    return pl.BlockSpec((tile_r, cols), lambda i: (i, 0))


def _resident_spec(shape):
    # Constant index map: stays resident in VMEM across all row tiles.
    return pl.BlockSpec(shape, lambda i: (0, 0))


def _params(semantics):
    return pltpu.CompilerParams(dimension_semantics=semantics,
                                vmem_limit_bytes=VMEM_LIMIT)


def _pad_cols(w, cp):
    return jnp.pad(w, ((0, 0), (0, cp - w.shape[1])))


def _pad_vec(v, cp):
    return jnp.pad(v, (0, cp - v.shape[0]))


# ------------------------------ Pallas kernels --------------------------------

def _stats_kernel(x_ref, sum_ref, sq_ref):
    """Per-column sum / sum-of-squares, accumulated across row tiles."""
    @pl.when(pl.program_id(0) == 0)
    def _():
        sum_ref[...] = jnp.zeros_like(sum_ref)
        sq_ref[...] = jnp.zeros_like(sq_ref)
    x = x_ref[...]
    sum_ref[...] += jnp.sum(x, axis=0, keepdims=True)
    sq_ref[...] += jnp.sum(x * x, axis=0, keepdims=True)


def _scale_shift_relu_kernel(x_ref, a_ref, b_ref, o_ref):
    """o = relu(x * a + b); a/b are resident (1, C) vectors; math in f32."""
    y = x_ref[...] * a_ref[...] + b_ref[...]
    o_ref[...] = jnp.maximum(y, 0.0).astype(o_ref.dtype)


def _conv1_stats_kernel(p_ref, w_ref, z_ref, sum_ref, sq_ref):
    """conv1 as im2col matmul (bf16 in, f32 accum), fused bn2 batch stats."""
    z = jnp.dot(p_ref[...], w_ref[...], preferred_element_type=jnp.float32)
    z_ref[...] = z

    @pl.when(pl.program_id(0) == 0)
    def _():
        sum_ref[...] = jnp.zeros_like(sum_ref)
        sq_ref[...] = jnp.zeros_like(sq_ref)
    sum_ref[...] += jnp.sum(z, axis=0, keepdims=True)
    sq_ref[...] += jnp.sum(z * z, axis=0, keepdims=True)


def _conv_residual_kernel(p2_ref, w2_ref, x3_ref, w3_ref, b_ref, o_ref):
    """conv2 (im2col matmul) + conv3 (1x1 residual matmul) + combined bias."""
    main = jnp.dot(p2_ref[...], w2_ref[...], preferred_element_type=jnp.float32)
    res = jnp.dot(x3_ref[...], w3_ref[...], preferred_element_type=jnp.float32)
    o_ref[...] = main + res + b_ref[...]


# ------------------------------ pallas_call wrappers ---------------------------

def _bn_stats(x2d, tile_r):
    rows, cols = x2d.shape
    return pl.pallas_call(
        _stats_kernel,
        grid=(rows // tile_r,),
        in_specs=[_row_spec(tile_r, cols)],
        out_specs=(_resident_spec((1, cols)), _resident_spec((1, cols))),
        out_shape=(jax.ShapeDtypeStruct((1, cols), jnp.float32),
                   jax.ShapeDtypeStruct((1, cols), jnp.float32)),
        compiler_params=_params(("arbitrary",)),   # cross-tile accumulation
    )(x2d)


def _scale_shift_relu(x2d, scale, shift, tile_r, out_dtype):
    rows, cols = x2d.shape
    return pl.pallas_call(
        _scale_shift_relu_kernel,
        grid=(rows // tile_r,),
        in_specs=[_row_spec(tile_r, cols),
                  _resident_spec((1, cols)),
                  _resident_spec((1, cols))],
        out_specs=_row_spec(tile_r, cols),
        out_shape=jax.ShapeDtypeStruct((rows, cols), out_dtype),
        compiler_params=_params(("parallel",)),
    )(x2d,
      scale.reshape(1, cols).astype(jnp.float32),
      shift.reshape(1, cols).astype(jnp.float32))


def _conv1_with_stats(patches, w, tile_r):
    rows, k = patches.shape
    cp = w.shape[1]
    return pl.pallas_call(
        _conv1_stats_kernel,
        grid=(rows // tile_r,),
        in_specs=[_row_spec(tile_r, k), _resident_spec((k, cp))],
        out_specs=(_row_spec(tile_r, cp),
                   _resident_spec((1, cp)), _resident_spec((1, cp))),
        out_shape=(jax.ShapeDtypeStruct((rows, cp), jnp.float32),
                   jax.ShapeDtypeStruct((1, cp), jnp.float32),
                   jax.ShapeDtypeStruct((1, cp), jnp.float32)),
        compiler_params=_params(("arbitrary",)),   # stats accumulate across tiles
    )(patches, w)


def _conv_residual(p2, w2, x3, w3, bias, tile_r):
    rows, k2 = p2.shape
    cp = w2.shape[1]
    k3 = x3.shape[1]
    return pl.pallas_call(
        _conv_residual_kernel,
        grid=(rows // tile_r,),
        in_specs=[_row_spec(tile_r, k2), _resident_spec((k2, cp)),
                  _row_spec(tile_r, k3), _resident_spec((k3, cp)),
                  _resident_spec((1, cp))],
        out_specs=_row_spec(tile_r, cp),
        out_shape=jax.ShapeDtypeStruct((rows, cp), jnp.float32),
        compiler_params=_params(("parallel",)),
    )(p2, w2, x3, w3, bias.reshape(1, cp).astype(jnp.float32))


# ------------------------------- JAX glue -------------------------------------

def _im2col(xp, k, stride):
    # xp: zero-padded NHWC.  Returns (N*Ho*Wo, k*k*C) patches in (kh, kw, c) order.
    N, Hp, Wp, C = xp.shape
    Ho = (Hp - k) // stride + 1
    Wo = (Wp - k) // stride + 1
    cols = []
    for i in range(k):
        for j in range(k):
            patch = lax.slice(
                xp, (0, i, j, 0),
                (N, i + stride * (Ho - 1) + 1, j + stride * (Wo - 1) + 1, C),
                (1, stride, stride, 1))
            cols.append(patch.reshape(N * Ho * Wo, C))
    return jnp.concatenate(cols, axis=1), Ho, Wo


def init_params(key, cin, cout):
    ks = jax.random.split(key, 10)
    return {
        "w1": 0.1 * jax.random.normal(ks[0], (cout, cin, 3, 3), jnp.float32),  # OIHW
        "b1": 0.1 * jax.random.normal(ks[1], (cout,), jnp.float32),
        "w2": 0.1 * jax.random.normal(ks[2], (cout, cout, 3, 3), jnp.float32),
        "b2": 0.1 * jax.random.normal(ks[3], (cout,), jnp.float32),
        "w3": 0.1 * jax.random.normal(ks[4], (cout, cin, 1, 1), jnp.float32),
        "b3": 0.1 * jax.random.normal(ks[5], (cout,), jnp.float32),
        "g1": 1.0 + 0.1 * jax.random.normal(ks[6], (cin,), jnp.float32),
        "bt1": 0.1 * jax.random.normal(ks[7], (cin,), jnp.float32),
        "g2": 1.0 + 0.1 * jax.random.normal(ks[8], (cout,), jnp.float32),
        "bt2": 0.1 * jax.random.normal(ks[9], (cout,), jnp.float32),
    }


def residual_block2_pallas(x_nchw, p):
    N, Cin, H, W = x_nchw.shape
    Cout = p["w1"].shape[0]
    CP = _round_up(Cout, LANES)                        # lane-dense output width

    x = jnp.transpose(x_nchw, (0, 2, 3, 1)).astype(jnp.float32)   # -> NHWC
    rows1 = N * H * W

    # Fold spatial positions into the lane axis so bn1 tiles are 128-lane dense
    # (contiguous reshape: free in XLA).
    fold = 1
    if LANES % Cin == 0:
        f = LANES // Cin
        if f > 1 and rows1 % f == 0:
            fold = f
    xf = x.reshape(rows1 // fold, fold * Cin)
    tile_a = _pick_row_tile(xf.shape[0])

    # ---- bn1: batch statistics (Pallas cross-tile sum/sumsq reduction) ----
    s1, sq1 = _bn_stats(xf, tile_a)
    s1 = s1.reshape(fold, Cin).sum(axis=0)
    sq1 = sq1.reshape(fold, Cin).sum(axis=0)
    mean1 = s1 / rows1
    var1 = jnp.maximum(sq1 / rows1 - mean1 * mean1, 0.0)
    scale1 = p["g1"] * lax.rsqrt(var1 + EPS)
    shift1 = p["bt1"] - mean1 * scale1

    # ---- bn1 apply + ReLU (lane-dense folded slab); bf16 output for the MXU ----
    yf = _scale_shift_relu(xf, jnp.tile(scale1, fold), jnp.tile(shift1, fold),
                           tile_a, jnp.bfloat16)
    y = yf.reshape(N, H, W, Cin)

    # ---- conv1: 3x3 stride 2 pad 1, fused with bn2 batch-stat reduction ----
    yp = jnp.pad(y, ((0, 0), (1, 1), (1, 1), (0, 0)))
    p1, Ho, Wo = _im2col(yp, 3, 2)                     # (rows_o, 9*Cin) bf16
    rows_o = N * Ho * Wo
    tile_c = _pick_row_tile(rows_o)
    w1m = jnp.transpose(p["w1"], (2, 3, 1, 0)).reshape(9 * Cin, Cout)
    w1m = _pad_cols(w1m, CP).astype(jnp.bfloat16)      # zero-pad output channels
    # conv1's bias (b1) is intentionally dropped: cancelled by bn2's mean sub.
    z, s2, sq2 = _conv1_with_stats(p1, w1m, tile_c)    # z: (rows_o, CP) f32

    # ---- bn2 apply + ReLU (scale/shift from fused stats), bf16 output ----
    mean2 = s2[0] / rows_o
    var2 = jnp.maximum(sq2[0] / rows_o - mean2 * mean2, 0.0)
    scale2 = _pad_vec(p["g2"], CP) * lax.rsqrt(var2 + EPS)
    shift2 = _pad_vec(p["bt2"], CP) - mean2 * scale2
    a = _scale_shift_relu(z, scale2, shift2, tile_c, jnp.bfloat16)   # (rows_o, CP)

    # ---- conv2 (3x3 s1 p1) + conv3 (1x1 s2 residual) + biases ----
    a_nhwc = a[:, :Cout].reshape(N, Ho, Wo, Cout)
    ap = jnp.pad(a_nhwc, ((0, 0), (1, 1), (1, 1), (0, 0)))
    p2, _, _ = _im2col(ap, 3, 1)                       # (rows_o, 9*Cout) bf16
    w2m = jnp.transpose(p["w2"], (2, 3, 1, 0)).reshape(9 * Cout, Cout)
    w2m = _pad_cols(w2m, CP).astype(jnp.bfloat16)
    x3 = y[:, ::2, ::2, :].reshape(rows_o, Cin)        # stride-2 residual input
    w3m = jnp.transpose(p["w3"], (2, 3, 1, 0)).reshape(Cin, Cout)
    w3m = _pad_cols(w3m, CP).astype(jnp.bfloat16)
    bias = _pad_vec(p["b2"] + p["b3"], CP)

    out = _conv_residual(p2, w2m, x3, w3m, bias, tile_c)   # (rows_o, CP) f32
    out = out[:, :Cout].reshape(N, Ho, Wo, Cout)
    return jnp.transpose(out, (0, 3, 1, 2))                # -> NCHW


# --------------------------- pure-JAX reference -------------------------------

def _ref_forward(x, p):
    def bn(v, g, b):
        m = v.mean(axis=(0, 2, 3), keepdims=True)
        var = ((v - m) ** 2).mean(axis=(0, 2, 3), keepdims=True)
        return (v - m) / jnp.sqrt(var + EPS) * g[None, :, None, None] \
            + b[None, :, None, None]

    def conv(v, w, b, stride, pad):
        o = lax.conv_general_dilated(
            v, w, (stride, stride), ((pad, pad), (pad, pad)),
            dimension_numbers=("NCHW", "OIHW", "NCHW"),
            precision=lax.Precision.HIGHEST)
        return o + b[None, :, None, None]

    v = jax.nn.relu(bn(x, p["g1"], p["bt1"]))
    out = conv(v, p["w1"], p["b1"], 2, 1)
    xr = conv(v, p["w3"], p["b3"], 2, 0)
    out = jax.nn.relu(bn(out, p["g2"], p["bt2"]))
    out = conv(out, p["w2"], p["b2"], 1, 1)
    return out + xr


if __name__ == "__main__":
    key = jax.random.PRNGKey(0)
    k_x, k_p = jax.random.split(key)

    N, Cin, Cout, H, W = 2, 4, 8, 16, 16
    x = jax.random.normal(k_x, (N, Cin, H, W), jnp.float32)
    params = init_params(k_p, Cin, Cout)

    fwd = jax.jit(residual_block2_pallas)
    out = jax.block_until_ready(fwd(x, params))
    ref = jax.block_until_ready(jax.jit(_ref_forward)(x, params))

    assert out.shape == (N, Cout, H // 2, W // 2), out.shape
    # bf16 matmul operands (f32 accumulation and f32 BN math) -> modest tolerance.
    assert bool(jnp.allclose(out, ref, atol=2e-2, rtol=2e-2)), \
        float(jnp.max(jnp.abs(out - ref)))
    print("KERNEL_OK")
</pallas_src>

<mosaic_0001>
module attributes {stable_mosaic.version = 11 : i64} {
  func.func @_stats_kernel(%arg0: i32, %arg1: memref<16x128xf32, #tpu.memory_space<vmem>>, %arg2: memref<1x128xf32, #tpu.memory_space<vmem>>, %arg3: memref<1x128xf32, #tpu.memory_space<vmem>>) attributes {dimension_semantics = [#tpu.dimension_semantics<arbitrary>], iteration_bounds = array<i64: 1>, scalar_prefetch = 0 : i64, scratch_operands = 0 : i64, tpu.core_type = #tpu.core_type<tc>, window_params = [{transform_indices = @transform_0, window_bounds = array<i64: 16, 128>}, {pipeline_mode = #tpu.pipeline_mode<synchronous>, transform_indices = @transform_1, window_bounds = array<i64: 1, 128>}, {pipeline_mode = #tpu.pipeline_mode<synchronous>, transform_indices = @transform_2, window_bounds = array<i64: 1, 128>}]} {
    %c0_i32 = arith.constant 0 : i32
    %0 = arith.cmpi eq, %arg0, %c0_i32 : i32
    %1 = arith.extui %0 : i1 to i32
    %c0_i32_0 = arith.constant 0 : i32
    %2 = arith.cmpi ne, %1, %c0_i32_0 : i32
    scf.if %2 {
      %cst_11 = arith.constant 0.000000e+00 : f32
      %15 = vector.broadcast %cst_11 : f32 to vector<1x128xf32>
      %c0_12 = arith.constant 0 : index
      %c0_13 = arith.constant 0 : index
      %16 = vector.load %arg2[%c0_12, %c0_13] : memref<1x128xf32, #tpu.memory_space<vmem>>, vector<1x128xf32>
      tpu.vector_store %arg2[%c0_12, %c0_13], %15 {strides = array<i32>} : memref<1x128xf32, #tpu.memory_space<vmem>>, vector<1x128xf32>,
      %cst_14 = arith.constant 0.000000e+00 : f32
      %17 = vector.broadcast %cst_14 : f32 to vector<1x128xf32>
      %c0_15 = arith.constant 0 : index
      %c0_16 = arith.constant 0 : index
      %18 = vector.load %arg3[%c0_15, %c0_16] : memref<1x128xf32, #tpu.memory_space<vmem>>, vector<1x128xf32>
      tpu.vector_store %arg3[%c0_15, %c0_16], %17 {strides = array<i32>} : memref<1x128xf32, #tpu.memory_space<vmem>>, vector<1x128xf32>,
    } else {
    }
    %c0 = arith.constant 0 : index
    %c0_1 = arith.constant 0 : index
    %3 = vector.load %arg1[%c0, %c0_1] : memref<16x128xf32, #tpu.memory_space<vmem>>, vector<16x128xf32>
    %c0_2 = arith.constant 0 : index
    %c0_3 = arith.constant 0 : index
    %4 = vector.load %arg2[%c0_2, %c0_3] : memref<1x128xf32, #tpu.memory_space<vmem>>, vector<1x128xf32>
    %cst = arith.constant dense<0.000000e+00> : vector<128xf32>
    %5 = vector.multi_reduction <add>, %3, %cst [0] : vector<16x128xf32> to vector<128xf32>
    %6 = vector.shape_cast %5 : vector<128xf32> to vector<1x128xf32>
    %7 = arith.addf %4, %6 : vector<1x128xf32>
    %c0_4 = arith.constant 0 : index
    %c0_5 = arith.constant 0 : index
    %8 = vector.load %arg2[%c0_4, %c0_5] : memref<1x128xf32, #tpu.memory_space<vmem>>, vector<1x128xf32>
    tpu.vector_store %arg2[%c0_4, %c0_5], %7 {strides = array<i32>} : memref<1x128xf32, #tpu.memory_space<vmem>>, vector<1x128xf32>,
    %c0_6 = arith.constant 0 : index
    %c0_7 = arith.constant 0 : index
    %9 = vector.load %arg3[%c0_6, %c0_7] : memref<1x128xf32, #tpu.memory_space<vmem>>, vector<1x128xf32>
    %10 = arith.mulf %3, %3 : vector<16x128xf32>
    %cst_8 = arith.constant dense<0.000000e+00> : vector<128xf32>
    %11 = vector.multi_reduction <add>, %10, %cst_8 [0] : vector<16x128xf32> to vector<128xf32>
    %12 = vector.shape_cast %11 : vector<128xf32> to vector<1x128xf32>
    %13 = arith.addf %9, %12 : vector<1x128xf32>
    %c0_9 = arith.constant 0 : index
    %c0_10 = arith.constant 0 : index
    %14 = vector.load %arg3[%c0_9, %c0_10] : memref<1x128xf32, #tpu.memory_space<vmem>>, vector<1x128xf32>
    tpu.vector_store %arg3[%c0_9, %c0_10], %13 {strides = array<i32>} : memref<1x128xf32, #tpu.memory_space<vmem>>, vector<1x128xf32>,
    return
  }
  func.func @transform_0(%arg0: i32) -> (i32, i32) {
    %c0_i32 = arith.constant 0 : i32
    %c0_i32_0 = arith.constant 0 : i32
    return %arg0, %c0_i32 : i32, i32
  }
  func.func @transform_1(%arg0: i32) -> (i32, i32) {
    %c0_i32 = arith.constant 0 : i32
    %c0_i32_0 = arith.constant 0 : i32
    %c0_i32_1 = arith.constant 0 : i32
    return %c0_i32, %c0_i32_0 : i32, i32
  }
  func.func @transform_2(%arg0: i32) -> (i32, i32) {
    %c0_i32 = arith.constant 0 : i32
    %c0_i32_0 = arith.constant 0 : i32
    %c0_i32_1 = arith.constant 0 : i32
    return %c0_i32, %c0_i32_0 : i32, i32
  }
}

module attributes {stable_mosaic.version = 11 : i64} {
  func.func @_scale_shift_relu_kernel(%arg0: i32, %arg1: memref<16x128xf32, #tpu.memory_space<vmem>>, %arg2: memref<1x128xf32, #tpu.memory_space<vmem>>, %arg3: memref<1x128xf32, #tpu.memory_space<vmem>>, %arg4: memref<16x128xbf16, #tpu.memory_space<vmem>>) attributes {dimension_semantics = [#tpu.dimension_semantics<parallel>], iteration_bounds = array<i64: 1>, scalar_prefetch = 0 : i64, scratch_operands = 0 : i64, tpu.core_type = #tpu.core_type<tc>, window_params = [{transform_indices = @transform_0, window_bounds = array<i64: 16, 128>}, {pipeline_mode = #tpu.pipeline_mode<synchronous>, transform_indices = @transform_1, window_bounds = array<i64: 1, 128>}, {pipeline_mode = #tpu.pipeline_mode<synchronous>, transform_indices = @transform_2, window_bounds = array<i64: 1, 128>}, {transform_indices = @transform_3, window_bounds = array<i64: 16, 128>}]} {
    %c0 = arith.constant 0 : index
    %c0_0 = arith.constant 0 : index
    %0 = vector.load %arg1[%c0, %c0_0] : memref<16x128xf32, #tpu.memory_space<vmem>>, vector<16x128xf32>
    %c0_1 = arith.constant 0 : index
    %c0_2 = arith.constant 0 : index
    %1 = vector.load %arg2[%c0_1, %c0_2] : memref<1x128xf32, #tpu.memory_space<vmem>>, vector<1x128xf32>
    %2 = vector.broadcast %1 : vector<1x128xf32> to vector<16x128xf32>
    %3 = arith.mulf %0, %2 : vector<16x128xf32>
    %c0_3 = arith.constant 0 : index
    %c0_4 = arith.constant 0 : index
    %4 = vector.load %arg3[%c0_3, %c0_4] : memref<1x128xf32, #tpu.memory_space<vmem>>, vector<1x128xf32>
    %5 = vector.broadcast %4 : vector<1x128xf32> to vector<16x128xf32>
    %6 = arith.addf %3, %5 : vector<16x128xf32>
    %cst = arith.constant 0.000000e+00 : f32
    %7 = vector.broadcast %cst : f32 to vector<16x128xf32>
    %8 = arith.maximumf %6, %7 : vector<16x128xf32>
    %9 = arith.truncf %8 : vector<16x128xf32> to vector<16x128xbf16>
    %c0_5 = arith.constant 0 : index
    %c0_6 = arith.constant 0 : index
    %10 = vector.load %arg4[%c0_5, %c0_6] : memref<16x128xbf16, #tpu.memory_space<vmem>>, vector<16x128xbf16>
    tpu.vector_store %arg4[%c0_5, %c0_6], %9 {strides = array<i32>} : memref<16x128xbf16, #tpu.memory_space<vmem>>, vector<16x128xbf16>,
    return
  }
  func.func @transform_0(%arg0: i32) -> (i32, i32) {
    %c0_i32 = arith.constant 0 : i32
    %c0_i32_0 = arith.constant 0 : i32
    return %arg0, %c0_i32 : i32, i32
  }
  func.func @transform_1(%arg0: i32) -> (i32, i32) {
    %c0_i32 = arith.constant 0 : i32
    %c0_i32_0 = arith.constant 0 : i32
    %c0_i32_1 = arith.constant 0 : i32
    return %c0_i32, %c0_i32_0 : i32, i32
  }
  func.func @transform_2(%arg0: i32) -> (i32, i32) {
    %c0_i32 = arith.constant 0 : i32
    %c0_i32_0 = arith.constant 0 : i32
    %c0_i32_1 = arith.constant 0 : i32
    return %c0_i32, %c0_i32_0 : i32, i32
  }
  func.func @transform_3(%arg0: i32) -> (i32, i32) {
    %c0_i32 = arith.constant 0 : i32
    %c0_i32_0 = arith.constant 0 : i32
    return %arg0, %c0_i32 : i32, i32
  }
}

module attributes {stable_mosaic.version = 11 : i64} {
  func.func @_conv1_stats_kernel(%arg0: i32, %arg1: memref<128x36xbf16, #tpu.memory_space<vmem>>, %arg2: memref<36x128xbf16, #tpu.memory_space<vmem>>, %arg3: memref<128x128xf32, #tpu.memory_space<vmem>>, %arg4: memref<1x128xf32, #tpu.memory_space<vmem>>, %arg5: memref<1x128xf32, #tpu.memory_space<vmem>>) attributes {dimension_semantics = [#tpu.dimension_semantics<arbitrary>], iteration_bounds = array<i64: 1>, scalar_prefetch = 0 : i64, scratch_operands = 0 : i64, tpu.core_type = #tpu.core_type<tc>, window_params = [{transform_indices = @transform_0, window_bounds = array<i64: 128, 36>}, {pipeline_mode = #tpu.pipeline_mode<synchronous>, transform_indices = @transform_1, window_bounds = array<i64: 36, 128>}, {transform_indices = @transform_2, window_bounds = array<i64: 128, 128>}, {pipeline_mode = #tpu.pipeline_mode<synchronous>, transform_indices = @transform_3, window_bounds = array<i64: 1, 128>}, {pipeline_mode = #tpu.pipeline_mode<synchronous>, transform_indices = @transform_4, window_bounds = array<i64: 1, 128>}]} {
    %c0 = arith.constant 0 : index
    %c0_0 = arith.constant 0 : index
    %0 = vector.load %arg1[%c0, %c0_0] : memref<128x36xbf16, #tpu.memory_space<vmem>>, vector<128x36xbf16>
    %c0_1 = arith.constant 0 : index
    %c0_2 = arith.constant 0 : index
    %1 = vector.load %arg2[%c0_1, %c0_2] : memref<36x128xbf16, #tpu.memory_space<vmem>>, vector<36x128xbf16>
    %cst = arith.constant dense<0.000000e+00> : vector<128x128xf32>
    %2 = tpu.matmul %0, %1, %cst {dimension_numbers = #tpu.dot_dimension_numbers<[1], [0], [0], [1], [0, 0, 1, 1], [], []>} : vector<128x36xbf16>, vector<36x128xbf16>, vector<128x128xf32> -> vector<128x128xf32>
    %c0_3 = arith.constant 0 : index
    %c0_4 = arith.constant 0 : index
    %3 = vector.load %arg3[%c0_3, %c0_4] : memref<128x128xf32, #tpu.memory_space<vmem>>, vector<128x128xf32>
    tpu.vector_store %arg3[%c0_3, %c0_4], %2 {strides = array<i32>} : memref<128x128xf32, #tpu.memory_space<vmem>>, vector<128x128xf32>,
    %c0_i32 = arith.constant 0 : i32
    %4 = arith.cmpi eq, %arg0, %c0_i32 : i32
    %5 = arith.extui %4 : i1 to i32
    %c0_i32_5 = arith.constant 0 : i32
    %6 = arith.cmpi ne, %5, %c0_i32_5 : i32
    scf.if %6 {
      %cst_16 = arith.constant 0.000000e+00 : f32
      %18 = vector.broadcast %cst_16 : f32 to vector<1x128xf32>
      %c0_17 = arith.constant 0 : index
      %c0_18 = arith.constant 0 : index
      %19 = vector.load %arg4[%c0_17, %c0_18] : memref<1x128xf32, #tpu.memory_space<vmem>>, vector<1x128xf32>
      tpu.vector_store %arg4[%c0_17, %c0_18], %18 {strides = array<i32>} : memref<1x128xf32, #tpu.memory_space<vmem>>, vector<1x128xf32>,
      %cst_19 = arith.constant 0.000000e+00 : f32
      %20 = vector.broadcast %cst_19 : f32 to vector<1x128xf32>
      %c0_20 = arith.constant 0 : index
      %c0_21 = arith.constant 0 : index
      %21 = vector.load %arg5[%c0_20, %c0_21] : memref<1x128xf32, #tpu.memory_space<vmem>>, vector<1x128xf32>
      tpu.vector_store %arg5[%c0_20, %c0_21], %20 {strides = array<i32>} : memref<1x128xf32, #tpu.memory_space<vmem>>, vector<1x128xf32>,
    } else {
    }
    %c0_6 = arith.constant 0 : index
    %c0_7 = arith.constant 0 : index
    %7 = vector.load %arg4[%c0_6, %c0_7] : memref<1x128xf32, #tpu.memory_space<vmem>>, vector<1x128xf32>
    %cst_8 = arith.constant dense<0.000000e+00> : vector<128xf32>
    %8 = vector.multi_reduction <add>, %2, %cst_8 [0] : vector<128x128xf32> to vector<128xf32>
    %9 = vector.shape_cast %8 : vector<128xf32> to vector<1x128xf32>
    %10 = arith.addf %7, %9 : vector<1x128xf32>
    %c0_9 = arith.constant 0 : index
    %c0_10 = arith.constant 0 : index
    %11 = vector.load %arg4[%c0_9, %c0_10] : memref<1x128xf32, #tpu.memory_space<vmem>>, vector<1x128xf32>
    tpu.vector_store %arg4[%c0_9, %c0_10], %10 {strides = array<i32>} : memref<1x128xf32, #tpu.memory_space<vmem>>, vector<1x128xf32>,
    %c0_11 = arith.constant 0 : index
    %c0_12 = arith.constant 0 : index
    %12 = vector.load %arg5[%c0_11, %c0_12] : memref<1x128xf32, #tpu.memory_space<vmem>>, vector<1x128xf32>
    %13 = arith.mulf %2, %2 : vector<128x128xf32>
    %cst_13 = arith.constant dense<0.000000e+00> : vector<128xf32>
    %14 = vector.multi_reduction <add>, %13, %cst_13 [0] : vector<128x128xf32> to vector<128xf32>
    %15 = vector.shape_cast %14 : vector<128xf32> to vector<1x128xf32>
    %16 = arith.addf %12, %15 : vector<1x128xf32>
    %c0_14 = arith.constant 0 : index
    %c0_15 = arith.constant 0 : index
    %17 = vector.load %arg5[%c0_14, %c0_15] : memref<1x128xf32, #tpu.memory_space<vmem>>, vector<1x128xf32>
    tpu.vector_store %arg5[%c0_14, %c0_15], %16 {strides = array<i32>} : memref<1x128xf32, #tpu.memory_space<vmem>>, vector<1x128xf32>,
    return
  }
  func.func @transform_0(%arg0: i32) -> (i32, i32) {
    %c0_i32 = arith.constant 0 : i32
    %c0_i32_0 = arith.constant 0 : i32
    return %arg0, %c0_i32 : i32, i32
  }
  func.func @transform_1(%arg0: i32) -> (i32, i32) {
    %c0_i32 = arith.constant 0 : i32
    %c0_i32_0 = arith.constant 0 : i32
    %c0_i32_1 = arith.constant 0 : i32
    return %c0_i32, %c0_i32_0 : i32, i32
  }
  func.func @transform_2(%arg0: i32) -> (i32, i32) {
    %c0_i32 = arith.constant 0 : i32
    %c0_i32_0 = arith.constant 0 : i32
    return %arg0, %c0_i32 : i32, i32
  }
  func.func @transform_3(%arg0: i32) -> (i32, i32) {
    %c0_i32 = arith.constant 0 : i32
    %c0_i32_0 = arith.constant 0 : i32
    %c0_i32_1 = arith.constant 0 : i32
    return %c0_i32, %c0_i32_0 : i32, i32
  }
  func.func @transform_4(%arg0: i32) -> (i32, i32) {
    %c0_i32 = arith.constant 0 : i32
    %c0_i32_0 = arith.constant 0 : i32
    %c0_i32_1 = arith.constant 0 : i32
    return %c0_i32, %c0_i32_0 : i32, i32
  }
}

module attributes {stable_mosaic.version = 11 : i64} {
  func.func @_scale_shift_relu_kernel(%arg0: i32, %arg1: memref<128x128xf32, #tpu.memory_space<vmem>>, %arg2: memref<1x128xf32, #tpu.memory_space<vmem>>, %arg3: memref<1x128xf32, #tpu.memory_space<vmem>>, %arg4: memref<128x128xbf16, #tpu.memory_space<vmem>>) attributes {dimension_semantics = [#tpu.dimension_semantics<parallel>], iteration_bounds = array<i64: 1>, scalar_prefetch = 0 : i64, scratch_operands = 0 : i64, tpu.core_type = #tpu.core_type<tc>, window_params = [{transform_indices = @transform_0, window_bounds = array<i64: 128, 128>}, {pipeline_mode = #tpu.pipeline_mode<synchronous>, transform_indices = @transform_1, window_bounds = array<i64: 1, 128>}, {pipeline_mode = #tpu.pipeline_mode<synchronous>, transform_indices = @transform_2, window_bounds = array<i64: 1, 128>}, {transform_indices = @transform_3, window_bounds = array<i64: 128, 128>}]} {
    %c0 = arith.constant 0 : index
    %c0_0 = arith.constant 0 : index
    %0 = vector.load %arg1[%c0, %c0_0] : memref<128x128xf32, #tpu.memory_space<vmem>>, vector<128x128xf32>
    %c0_1 = arith.constant 0 : index
    %c0_2 = arith.constant 0 : index
    %1 = vector.load %arg2[%c0_1, %c0_2] : memref<1x128xf32, #tpu.memory_space<vmem>>, vector<1x128xf32>
    %2 = vector.broadcast %1 : vector<1x128xf32> to vector<128x128xf32>
    %3 = arith.mulf %0, %2 : vector<128x128xf32>
    %c0_3 = arith.constant 0 : index
    %c0_4 = arith.constant 0 : index
    %4 = vector.load %arg3[%c0_3, %c0_4] : memref<1x128xf32, #tpu.memory_space<vmem>>, vector<1x128xf32>
    %5 = vector.broadcast %4 : vector<1x128xf32> to vector<128x128xf32>
    %6 = arith.addf %3, %5 : vector<128x128xf32>
    %cst = arith.constant 0.000000e+00 : f32
    %7 = vector.broadcast %cst : f32 to vector<128x128xf32>
    %8 = arith.maximumf %6, %7 : vector<128x128xf32>
    %9 = arith.truncf %8 : vector<128x128xf32> to vector<128x128xbf16>
    %c0_5 = arith.constant 0 : index
    %c0_6 = arith.constant 0 : index
    %10 = vector.load %arg4[%c0_5, %c0_6] : memref<128x128xbf16, #tpu.memory_space<vmem>>, vector<128x128xbf16>
    tpu.vector_store %arg4[%c0_5, %c0_6], %9 {strides = array<i32>} : memref<128x128xbf16, #tpu.memory_space<vmem>>, vector<128x128xbf16>,
    return
  }
  func.func @transform_0(%arg0: i32) -> (i32, i32) {
    %c0_i32 = arith.constant 0 : i32
    %c0_i32_0 = arith.constant 0 : i32
    return %arg0, %c0_i32 : i32, i32
  }
  func.func @transform_1(%arg0: i32) -> (i32, i32) {
    %c0_i32 = arith.constant 0 : i32
    %c0_i32_0 = arith.constant 0 : i32
    %c0_i32_1 = arith.constant 0 : i32
    return %c0_i32, %c0_i32_0 : i32, i32
  }
  func.func @transform_2(%arg0: i32) -> (i32, i32) {
    %c0_i32 = arith.constant 0 : i32
    %c0_i32_0 = arith.constant 0 : i32
    %c0_i32_1 = arith.constant 0 : i32
    return %c0_i32, %c0_i32_0 : i32, i32
  }
  func.func @transform_3(%arg0: i32) -> (i32, i32) {
    %c0_i32 = arith.constant 0 : i32
    %c0_i32_0 = arith.constant 0 : i32
    return %arg0, %c0_i32 : i32, i32
  }
}

module attributes {stable_mosaic.version = 11 : i64} {
  func.func @_conv_residual_kernel(%arg0: i32, %arg1: memref<128x72xbf16, #tpu.memory_space<vmem>>, %arg2: memref<72x128xbf16, #tpu.memory_space<vmem>>, %arg3: memref<128x4xbf16, #tpu.memory_space<vmem>>, %arg4: memref<4x128xbf16, #tpu.memory_space<vmem>>, %arg5: memref<1x128xf32, #tpu.memory_space<vmem>>, %arg6: memref<128x128xf32, #tpu.memory_space<vmem>>) attributes {dimension_semantics = [#tpu.dimension_semantics<parallel>], iteration_bounds = array<i64: 1>, scalar_prefetch = 0 : i64, scratch_operands = 0 : i64, tpu.core_type = #tpu.core_type<tc>, window_params = [{transform_indices = @transform_0, window_bounds = array<i64: 128, 72>}, {pipeline_mode = #tpu.pipeline_mode<synchronous>, transform_indices = @transform_1, window_bounds = array<i64: 72, 128>}, {transform_indices = @transform_2, window_bounds = array<i64: 128, 4>}, {pipeline_mode = #tpu.pipeline_mode<synchronous>, transform_indices = @transform_3, window_bounds = array<i64: 4, 128>}, {pipeline_mode = #tpu.pipeline_mode<synchronous>, transform_indices = @transform_4, window_bounds = array<i64: 1, 128>}, {transform_indices = @transform_5, window_bounds = array<i64: 128, 128>}]} {
    %c0 = arith.constant 0 : index
    %c0_0 = arith.constant 0 : index
    %0 = vector.load %arg1[%c0, %c0_0] : memref<128x72xbf16, #tpu.memory_space<vmem>>, vector<128x72xbf16>
    %c0_1 = arith.constant 0 : index
    %c0_2 = arith.constant 0 : index
    %1 = vector.load %arg2[%c0_1, %c0_2] : memref<72x128xbf16, #tpu.memory_space<vmem>>, vector<72x128xbf16>
    %cst = arith.constant dense<0.000000e+00> : vector<128x128xf32>
    %2 = tpu.matmul %0, %1, %cst {dimension_numbers = #tpu.dot_dimension_numbers<[1], [0], [0], [1], [0, 0, 1, 1], [], []>} : vector<128x72xbf16>, vector<72x128xbf16>, vector<128x128xf32> -> vector<128x128xf32>
    %c0_3 = arith.constant 0 : index
    %c0_4 = arith.constant 0 : index
    %3 = vector.load %arg3[%c0_3, %c0_4] : memref<128x4xbf16, #tpu.memory_space<vmem>>, vector<128x4xbf16>
    %c0_5 = arith.constant 0 : index
    %c0_6 = arith.constant 0 : index
    %4 = vector.load %arg4[%c0_5, %c0_6] : memref<4x128xbf16, #tpu.memory_space<vmem>>, vector<4x128xbf16>
    %cst_7 = arith.constant dense<0.000000e+00> : vector<128x128xf32>
    %5 = tpu.matmul %3, %4, %cst_7 {dimension_numbers = #tpu.dot_dimension_numbers<[1], [0], [0], [1], [0, 0, 1, 1], [], []>} : vector<128x4xbf16>, vector<4x128xbf16>, vector<128x128xf32> -> vector<128x128xf32>
    %6 = arith.addf %2, %5 : vector<128x128xf32>
    %c0_8 = arith.constant 0 : index
    %c0_9 = arith.constant 0 : index
    %7 = vector.load %arg5[%c0_8, %c0_9] : memref<1x128xf32, #tpu.memory_space<vmem>>, vector<1x128xf32>
    %8 = vector.broadcast %7 : vector<1x128xf32> to vector<128x128xf32>
    %9 = arith.addf %6, %8 : vector<128x128xf32>
    %c0_10 = arith.constant 0 : index
    %c0_11 = arith.constant 0 : index
    %10 = vector.load %arg6[%c0_10, %c0_11] : memref<128x128xf32, #tpu.memory_space<vmem>>, vector<128x128xf32>
    tpu.vector_store %arg6[%c0_10, %c0_11], %9 {strides = array<i32>} : memref<128x128xf32, #tpu.memory_space<vmem>>, vector<128x128xf32>,
    return
  }
  func.func @transform_0(%arg0: i32) -> (i32, i32) {
    %c0_i32 = arith.constant 0 : i32
    %c0_i32_0 = arith.constant 0 : i32
    return %arg0, %c0_i32 : i32, i32
  }
  func.func @transform_1(%arg0: i32) -> (i32, i32) {
    %c0_i32 = arith.constant 0 : i32
    %c0_i32_0 = arith.constant 0 : i32
    %c0_i32_1 = arith.constant 0 : i32
    return %c0_i32, %c0_i32_0 : i32, i32
  }
  func.func @transform_2(%arg0: i32) -> (i32, i32) {
    %c0_i32 = arith.constant 0 : i32
    %c0_i32_0 = arith.constant 0 : i32
    return %arg0, %c0_i32 : i32, i32
  }
  func.func @transform_3(%arg0: i32) -> (i32, i32) {
    %c0_i32 = arith.constant 0 : i32
    %c0_i32_0 = arith.constant 0 : i32
    %c0_i32_1 = arith.constant 0 : i32
    return %c0_i32, %c0_i32_0 : i32, i32
  }
  func.func @transform_4(%arg0: i32) -> (i32, i32) {
    %c0_i32 = arith.constant 0 : i32
    %c0_i32_0 = arith.constant 0 : i32
    %c0_i32_1 = arith.constant 0 : i32
    return %c0_i32, %c0_i32_0 : i32, i32
  }
  func.func @transform_5(%arg0: i32) -> (i32, i32) {
    %c0_i32 = arith.constant 0 : i32
    %c0_i32_0 = arith.constant 0 : i32
    return %arg0, %c0_i32 : i32, i32
  }
}

</mosaic_0001>

<bundles_post_ra>
// kernel: tile.17
= control target key start
LH: loop header
LB: loop body
LE: loop exit
PB: predicated region body
PF: predicated region fallthrough
CT: control target
= control target key end

     0   :  { %s40_s0 = inlined_call_operand.vmem [shape: f32[4], index: 0, kind: input, shape index: {}]   ;;  %s41_s1 = inlined_call_operand.vmem [shape: f32[32,4], index: 1, kind: output, shape index: {}]  }
   0x1   :  { %v4_v0 = vld [vmem:[%s40_s0] ss:$0 sm:$0xff] }
   0x2   :  { %5 = vst [vmem:[%s41_s1] sm:$0xff] %v4_v0  ;;  %12 = vst [vmem:[%s41_s1 + $0x8] sm:$0xff] %v4_v0 }
   0x3   :  { %13 = vst [vmem:[%s41_s1 + $0x10] sm:$0xff] %v4_v0  ;;  %14 = vst [vmem:[%s41_s1 + $0x18] sm:$0xff] %v4_v0 }

// kernel: tile.19
= control target key start
LH: loop header
LB: loop body
LE: loop exit
PB: predicated region body
PF: predicated region fallthrough
CT: control target
= control target key end

     0   :  { %s259_s10 = smov 124   ;;  %s260_s11 = smov 116   ;;  %vm3_vm0 = vcmask 31744   ;;  %vm9_vm1 = vcmask 1048544   ;;  %vm15_vm2 = vcmask 1015744   ;;  %vm21_vm3 = vcmask 982944   ;;  %s399_s0 = inlined_call_operand.vmem [shape: f32[32,4], index: 0, kind: input, shape index: {}]   ;;  %s400_s1 = inlined_call_operand.vmem [shape: f32[1,128], index: 1, kind: output, shape index: {}]  }
   0x1   :  { %v197_v0 = vld [vmem:[%s399_s0 + $0x1f] sm:$0x1]   ;;  %v199_v1 = vld [vmem:[%s399_s0 + $0x1d] sm:$0x1]   ;;  %v198_v2 = vld [vmem:[%s399_s0 + $0x1e] sm:$0x1]  }
   0x2   :  { %7 = vrot.lane.b32.xlu0 %v197_v0, %s259_s10  ;;  %19 = vrot.lane.b32.xlu1 %v199_v1, %s260_s11  ;;  %v200_v3 = vld [vmem:[%s399_s0 + $0x1c] sm:$0x1]   ;;  %s261_s16 = smov 120   ;;  %s262_s17 = smov 112   ;;  %v201_v4 = vld [vmem:[%s399_s0 + $0x1b] sm:$0x1]  }
   0x3   :  { %v202_v5 = vld [vmem:[%s399_s0 + $0x1a] sm:$0x1]   ;;  %s263_s22 = smov 108   ;;  %s264_s23 = smov 104   ;;  %v203_v6 = vld [vmem:[%s399_s0 + $0x19] sm:$0x1]  }
   0x4   :  { %v204_v7 = vld [vmem:[%s399_s0 + $0x18] sm:$0x1]   ;;  %s265_s28 = smov 100   ;;  %s266_s29 = smov 96   ;;  %v205_v8 = vld [vmem:[%s399_s0 + $0x17] sm:$0x1]  }
   0x5   :  { %v206_v9 = vld [vmem:[%s399_s0 + $0x16] sm:$0x1]   ;;  %v2_v10 = vld [vmem:[%s399_s0] sm:$0x1]   ;;  %s267_s7 = smov 92   ;;  %s268_s8 = smov 88  }
   0x6   :  { %13 = vrot.lane.b32.xlu0 %v198_v2, %s261_s16  ;;  %25 = vrot.lane.b32.xlu1 %v200_v3, %s262_s17  ;;  %4 = vst.msk [vmem:[#allocation0] sm:$0x1] %vm3_vm0, %v2_v10   ;;  %v207_v11 = vld [vmem:[%s399_s0 + $0x15] sm:$0x1]   ;;  %v208_v12 = vld [vmem:[%s399_s0 + $0x14] sm:$0x1]  }
   0x7   :  { %s269_s13 = smov 84   ;;  %s270_s14 = smov 80   ;;  %v209_v13 = vld [vmem:[%s399_s0 + $0x13] sm:$0x1]   ;;  %v210_v14 = vld [vmem:[%s399_s0 + $0x12] sm:$0x1]  }
   0x8   :  { %s271_s19 = smov 76   ;;  %s272_s20 = smov 72   ;;  %v211_v15 = vld [vmem:[%s399_s0 + $0x11] sm:$0x1]   ;;  %v212_v16 = vld [vmem:[%s399_s0 + $0x10] sm:$0x1]  }
   0x9   :  { %s273_s25 = smov 68   ;;  %s274_s26 = smov 64   ;;  %v213_v17 = vld [vmem:[%s399_s0 + $0xf] sm:$0x1]   ;;  %v214_v18 = vld [vmem:[%s399_s0 + $0xe] sm:$0x1]  }
   0xa   :  { %31 = vrot.lane.b32.xlu0 %v201_v4, %s263_s22  ;;  %37 = vrot.lane.b32.xlu1 %v202_v5, %s264_s23  ;;  %s275_s2 = smov 60   ;;  %s276_s3 = smov 56   ;;  %v215_v19 = vld [vmem:[%s399_s0 + $0xd] sm:$0x1]   ;;  %v216_v20 = vld [vmem:[%s399_s0 + $0xc] sm:$0x1]  }
   0xb   :  { %s278_s9 = smov 48   ;;  %v217_v21 = vld [vmem:[%s399_s0 + $0xb] sm:$0x1]   ;;  %v218_v22 = vld [vmem:[%s399_s0 + $0xa] sm:$0x1]   ;;  %s280_s15 = smov 40  }
   0xc   :  { %v219_v23 = vld [vmem:[%s399_s0 + $0x9] sm:$0x1]   ;;  %v220_v24 = vld [vmem:[%s399_s0 + $0x8] sm:$0x1]   ;;  %s282_s21 = smov 32   ;;  %s284_s27 = smov 24  }
   0xd   :  { %v221_v25 = vld [vmem:[%s399_s0 + $0x7] sm:$0x1]   ;;  %v222_v26 = vld [vmem:[%s399_s0 + $0x6] sm:$0x1]   ;;  %v223_v27 = vld [vmem:[%s399_s0 + $0x5] sm:$0x1]  }
   0xe   :  { %43 = vrot.lane.b32.xlu0 %v203_v6, %s265_s28  ;;  %49 = vrot.lane.b32.xlu1 %v204_v7, %s266_s29  ;;  %v224_v28 = vld [vmem:[%s399_s0 + $0x4] sm:$0x1]   ;;  %s286_s4 = smov 16   ;;  %v225_v29 = vld [vmem:[%s399_s0 + $0x3] sm:$0x1]   ;;  %s288_s10 = smov 8  }
   0xf   :  { %v226_v30 = vld [vmem:[%s399_s0 + $0x2] sm:$0x1]   ;;  %v227_v31 = vld [vmem:[%s399_s0 + $0x1] sm:$0x1]   ;;  %s289_s0 = smov 4   ;;  %vm27_vm4 = vcmask 950144  }
  0x10   :  { %vm33_vm5 = vcmask 917344   ;;  %vm39_vm6 = vcmask 884544   ;;  %vm45_vm7 = vcmask 851744   ;;  %vm51_vm8 = vcmask 818944  }
  0x11   :  { %vm57_vm9 = vcmask 786144   ;;  %vm63_vm10 = vcmask 753344   ;;  %vm69_vm11 = vcmask 720544   ;;  %vm75_vm12 = vcmask 687744  }
  0x12   :  { %55 = vrot.lane.b32.xlu0 %v205_v8, %s267_s7  ;;  %61 = vrot.lane.b32.xlu1 %v206_v9, %s268_s8  ;;  %s277_s8 = smov 52   ;;  %vm81_vm13 = vcmask 654944   ;;  %vm87_vm14 = vcmask 622144   ;;  %vm93_vm15 = vcmask 589344   ;;  %vm99_vm0 = vcmask 556544  }
  0x16   :  { %67 = vrot.lane.b32.xlu0 %v207_v11, %s269_s13  ;;  %73 = vrot.lane.b32.xlu1 %v208_v12, %s270_s14  ;;  %s279_s14 = smov 44  }
  0x1a   :  { %79 = vrot.lane.b32.xlu0 %v209_v13, %s271_s19  ;;  %85 = vrot.lane.b32.xlu1 %v210_v14, %s272_s20  ;;  %s281_s20 = smov 36  }
  0x1e   :  { %91 = vrot.lane.b32.xlu0 %v211_v15, %s273_s25  ;;  %97 = vrot.lane.b32.xlu1 %v212_v16, %s274_s26  ;;  %s283_s26 = smov 28  }
  0x22   :  { %103 = vrot.lane.b32.xlu0 %v213_v17, %s275_s2  ;;  %109 = vrot.lane.b32.xlu1 %v214_v18, %s276_s3  ;;  %s285_s3 = smov 20  }
  0x26   :  { %115 = vrot.lane.b32.xlu0 %v215_v19, %s277_s8  ;;  %121 = vrot.lane.b32.xlu1 %v216_v20, %s278_s9  ;;  %s287_s9 = smov 12  }
  0x2a   :  { %127 = vrot.lane.b32.xlu0 %v217_v21, %s279_s14  ;;  %133 = vrot.lane.b32.xlu1 %v218_v22, %s280_s15 }
  0x2e   :  { %139 = vrot.lane.b32.xlu0 %v219_v23, %s281_s20  ;;  %145 = vrot.lane.b32.xlu1 %v220_v24, %s282_s21 }
  0x32   :  { %151 = vrot.lane.b32.xlu0 %v221_v25, %s283_s26  ;;  %157 = vrot.lane.b32.xlu1 %v222_v26, %s284_s27 }
  0x36   :  { %163 = vrot.lane.b32.xlu0 %v223_v27, %s285_s3  ;;  %169 = vrot.lane.b32.xlu1 %v224_v28, %s286_s4 }
  0x3a   :  { %175 = vrot.lane.b32.xlu0 %v225_v29, %s287_s9  ;;  %181 = vrot.lane.b32.xlu1 %v226_v30, %s288_s10 }
  0x3e   :  { %187 = vrot.lane.b32.xlu0 %v227_v31, %s289_s0 }
  0x74   :  { %v8_v32 = vpop.permute.xlu0 %7   ;;  %v20_v33 = vpop.permute.xlu1 %19  }
  0x75   :  { %10 = vst.msk [vmem:[#allocation0] sm:$0x1] %vm9_vm1, %v8_v32   ;;  %vm105_vm1 = vcmask 523744  }
  0x78   :  { %v14_v34 = vpop.permute.xlu0 %13   ;;  %v26_v35 = vpop.permute.xlu1 %25  }
  0x79   :  { %16 = vst.msk [vmem:[#allocation0] sm:$0x1] %vm15_vm2, %v14_v34   ;;  %vm111_vm2 = vcmask 490944  }
  0x7a   :  { %22 = vst.msk [vmem:[#allocation0] sm:$0x1] %vm21_vm3, %v20_v33   ;;  %vm117_vm3 = vcmask 458144  }
  0x7b   :  { %28 = vst.msk [vmem:[#allocation0] sm:$0x1] %vm27_vm4, %v26_v35   ;;  %vm123_vm4 = vcmask 425344  }
  0x7c   :  { %v32_v36 = vpop.permute.xlu0 %31   ;;  %v38_v37 = vpop.permute.xlu1 %37  }
  0x7d   :  { %34 = vst.msk [vmem:[#allocation0] sm:$0x1] %vm33_vm5, %v32_v36   ;;  %vm129_vm5 = vcmask 392544  }
  0x7e   :  { %40 = vst.msk [vmem:[#allocation0] sm:$0x1] %vm39_vm6, %v38_v37   ;;  %vm135_vm6 = vcmask 359744  }
  0x80   :  { %v44_v38 = vpop.permute.xlu0 %43   ;;  %v50_v39 = vpop.permute.xlu1 %49  }
  0x81   :  { %46 = vst.msk [vmem:[#allocation0] sm:$0x1] %vm45_vm7, %v44_v38   ;;  %vm141_vm7 = vcmask 326944  }
  0x82   :  { %52 = vst.msk [vmem:[#allocation0] sm:$0x1] %vm51_vm8, %v50_v39   ;;  %vm147_vm8 = vcmask 294144  }
  0x84   :  { %v56_v40 = vpop.permute.xlu0 %55   ;;  %v62_v41 = vpop.permute.xlu1 %61  }
  0x85   :  { %58 = vst.msk [vmem:[#allocation0] sm:$0x1] %vm57_vm9, %v56_v40   ;;  %vm153_vm9 = vcmask 261344  }
  0x86   :  { %64 = vst.msk [vmem:[#allocation0] sm:$0x1] %vm63_vm10, %v62_v41   ;;  %vm159_vm10 = vcmask 228544  }
  0x88   :  { %v68_v42 = vpop.permute.xlu0 %67   ;;  %v74_v43 = vpop.permute.xlu1 %73  }
  0x89   :  { %70 = vst.msk [vmem:[#allocation0] sm:$0x1] %vm69_vm11, %v68_v42   ;;  %vm165_vm11 = vcmask 195744  }
  0x8a   :  { %76 = vst.msk [vmem:[#allocation0] sm:$0x1] %vm75_vm12, %v74_v43   ;;  %vm171_vm12 = vcmask 162944  }
  0x8c   :  { %v80_v44 = vpop.permute.xlu0 %79   ;;  %v86_v45 = vpop.permute.xlu1 %85  }
  0x8d   :  { %82 = vst.msk [vmem:[#allocation0] sm:$0x1] %vm81_vm13, %v80_v44   ;;  %vm177_vm13 = vcmask 130144  }
  0x8e   :  { %88 = vst.msk [vmem:[#allocation0] sm:$0x1] %vm87_vm14, %v86_v45   ;;  %vm183_vm14 = vcmask 97344  }
  0x90   :  { %v92_v46 = vpop.permute.xlu0 %91   ;;  %v98_v47 = vpop.permute.xlu1 %97  }
  0x91   :  { %94 = vst.msk [vmem:[#allocation0] sm:$0x1] %vm93_vm15, %v92_v46   ;;  %vm189_vm15 = vcmask 64544  }
  0x92   :  { %100 = vst.msk [vmem:[#allocation0] sm:$0x1] %vm99_vm0, %v98_v47  }
  0x94   :  { %v104_v48 = vpop.permute.xlu0 %103   ;;  %v110_v49 = vpop.permute.xlu1 %109  }
  0x95   :  { %106 = vst.msk [vmem:[#allocation0] sm:$0x1] %vm105_vm1, %v104_v48  }
  0x96   :  { %112 = vst.msk [vmem:[#allocation0] sm:$0x1] %vm111_vm2, %v110_v49  }
  0x98   :  { %v116_v50 = vpop.permute.xlu0 %115   ;;  %v122_v51 = vpop.permute.xlu1 %121  }
  0x99   :  { %118 = vst.msk [vmem:[#allocation0] sm:$0x1] %vm117_vm3, %v116_v50  }
  0x9a   :  { %124 = vst.msk [vmem:[#allocation0] sm:$0x1] %vm123_vm4, %v122_v51  }
  0x9c   :  { %v128_v52 = vpop.permute.xlu0 %127   ;;  %v134_v53 = vpop.permute.xlu1 %133  }
  0x9d   :  { %130 = vst.msk [vmem:[#allocation0] sm:$0x1] %vm129_vm5, %v128_v52  }
  0x9e   :  { %136 = vst.msk [vmem:[#allocation0] sm:$0x1] %vm135_vm6, %v134_v53  }
  0xa0   :  { %v140_v54 = vpop.permute.xlu0 %139   ;;  %v146_v55 = vpop.permute.xlu1 %145  }
  0xa1   :  { %142 = vst.msk [vmem:[#allocation0] sm:$0x1] %vm141_vm7, %v140_v54  }
  0xa2   :  { %148 = vst.msk [vmem:[#allocation0] sm:$0x1] %vm147_vm8, %v146_v55  }
  0xa4   :  { %v152_v56 = vpop.permute.xlu0 %151   ;;  %v158_v57 = vpop.permute.xlu1 %157  }
  0xa5   :  { %154 = vst.msk [vmem:[#allocation0] sm:$0x1] %vm153_vm9, %v152_v56  }
  0xa6   :  { %160 = vst.msk [vmem:[#allocation0] sm:$0x1] %vm159_vm10, %v158_v57  }
  0xa8   :  { %v164_v58 = vpop.permute.xlu0 %163   ;;  %v170_v59 = vpop.permute.xlu1 %169  }
  0xa9   :  { %166 = vst.msk [vmem:[#allocation0] sm:$0x1] %vm165_vm11, %v164_v58  }
  0xaa   :  { %172 = vst.msk [vmem:[#allocation0] sm:$0x1] %vm171_vm12, %v170_v59  }
  0xac   :  { %v176_v60 = vpop.permute.xlu0 %175   ;;  %v182_v61 = vpop.permute.xlu1 %181  }
  0xad   :  { %178 = vst.msk [vmem:[#allocation0] sm:$0x1] %vm177_vm13, %v176_v60  }
  0xae   :  { %184 = vst.msk [vmem:[#allocation0] sm:$0x1] %vm183_vm14, %v182_v61  }
  0xb0   :  { %v188_v62 = vpop.permute.xlu0 %187  }
  0xb1   :  { %190 = vst.msk [vmem:[#allocation0] sm:$0x1] %vm189_vm15, %v188_v62  }
  0xb8   :  { %v194_v63 = vld [vmem:[#allocation0] sm:$0x1] }
  0xb9   :  { %196 = vst [vmem:[%s400_s1] sm:$0x1] %v194_v63 }

// kernel: residual_block2_pallas.5
= control target key start
LH: loop header
LB: loop body
LE: loop exit
PB: predicated region body
PF: predicated region fallthrough
CT: control target
= control target key end

     0   :  { %v49_v0 = vmov 0.0   ;;  %s89_s1 = inlined_call_operand.vmem [shape: f32[1,128], index: 1, kind: output, shape index: {0}]   ;;  %s90_s2 = inlined_call_operand.vmem [shape: f32[1,128], index: 2, kind: output, shape index: {1}]   ;;  %s91_s0 = inlined_call_operand.vmem [shape: f32[16,128], index: 0, kind: input, shape index: {}]  }
   0x1   :  { %14 = vst [vmem:[%s89_s1] sm:$0x1] %v49_v0  ;;  %15 = vst [vmem:[%s90_s2] sm:$0x1] %v49_v0  ;;  %v16_v1 = vld [vmem:[%s91_s0] sm:$0xff]  ;;  %v17_v2 = vld [vmem:[%s91_s0 + $0x8] sm:$0xff] }
   0x2   :  { %v19_v3 = vadd.f32 %v17_v2, %v16_v1  ;;  %v29_v4 = vmul.f32 %v16_v1, %v16_v1  ;;  %v30_v5 = vmul.f32 %v17_v2, %v17_v2 }
   0x4   :  { %v20_v6 = vrot.slane %v19_v3, 4  ;;  %v31_v7 = vadd.f32 %v30_v5, %v29_v4 }
   0x6   :  { %v21_v8 = vadd.f32 %v20_v6, %v19_v3  ;;  %v32_v9 = vrot.slane %v31_v7, 4 }
   0x8   :  { %v22_v10 = vrot.slane %v21_v8, 2  ;;  %v33_v11 = vadd.f32 %v32_v9, %v31_v7  ;;  %v18_v16 = vld [vmem:[%s89_s1] sm:$0x1] }
   0x9   :  { %v28_v19 = vld [vmem:[%s90_s2] sm:$0x1] }
   0xa   :  { %v23_v12 = vadd.f32 %v22_v10, %v21_v8  ;;  %v34_v13 = vrot.slane %v33_v11, 2 }
   0xc   :  { %v24_v14 = vrot.slane %v23_v12, 1  ;;  %v35_v15 = vadd.f32 %v34_v13, %v33_v11 }
   0xe   :  { %v25_v17 = vadd.f32 %v24_v14, %v23_v12  ;;  %v36_v18 = vrot.slane %v35_v15, 1 }
  0x10   :  { %v26_v20 = vadd.f32 %v25_v17, %v18_v16  ;;  %v37_v21 = vadd.f32 %v36_v18, %v35_v15 }
  0x12   :  { %27 = vst [vmem:[%s89_s1] sm:$0x1] %v26_v20  ;;  %v38_v22 = vadd.f32 %v37_v21, %v28_v19 }
  0x14   :  { %39 = vst [vmem:[%s90_s2] sm:$0x1] %v38_v22 }

// kernel: residual_block2_pallas.6
= control target key start
LH: loop header
LB: loop body
LE: loop exit
PB: predicated region body
PF: predicated region fallthrough
CT: control target
= control target key end

     0   :  { %s96_s0 = inlined_call_operand.vmem [shape: f32[16,128], index: 0, kind: input, shape index: {}]   ;;  %s97_s1 = inlined_call_operand.vmem [shape: f32[1,128], index: 1, kind: input, shape index: {}]   ;;  %s98_s2 = inlined_call_operand.vmem [shape: f32[1,128], index: 2, kind: input, shape index: {}]   ;;  %s99_s3 = inlined_call_operand.vmem [shape: bf16[16,128], index: 3, kind: output, shape index: {}]  }
   0x1   :  { %v14_v0 = vld [vmem:[%s96_s0] sm:$0xff]  ;;  %v15_v1 = vld [vmem:[%s96_s0 + $0x8] sm:$0xff] }
   0x2   :  { %v50_v2 = vld [vmem:[%s97_s1] ss:$0 sm:$0xff] }
   0x3   :  { %v23_v3 = vmul.f32 %v50_v2, %v14_v0  ;;  %v24_v4 = vmul.f32 %v50_v2, %v15_v1  ;;  %v51_v5 = vld [vmem:[%s98_s2] ss:$0 sm:$0xff] }
   0x5   :  { %v32_v6 = vadd.f32 %v51_v5, %v23_v3  ;;  %v33_v7 = vadd.f32 %v51_v5, %v24_v4 }
   0x7   :  { %v34_v8 = vmax.f32 %v32_v6, 0.0  ;;  %v35_v9 = vmax.f32 %v33_v7, 0.0 }
   0x9   :  { %v59_v10 = vpack.c.bf16 %v35_v9, %v34_v8 }
   0xb   :  { %60 = vst [vmem:[%s99_s3] sm:$0xff] %v59_v10  }

// kernel: residual_block2_pallas.7
= control target key start
LH: loop header
LB: loop body
LE: loop exit
PB: predicated region body
PF: predicated region fallthrough
CT: control target
= control target key end

     0   :  { %vm91_vm0 = vcmask 293888   ;;  %vm116_vm1 = vcmask 1041408   ;;  %v387_v12 = vmov 0.0   ;;  %s520_s1 = inlined_call_operand.vmem [shape: bf16[36,128], index: 1, kind: input, shape index: {}]   ;;  %s521_s0 = inlined_call_operand.vmem [shape: bf16[128,36], index: 0, kind: input, shape index: {}]   ;;  %s522_s3 = inlined_call_operand.vmem [shape: f32[1,128], index: 3, kind: output, shape index: {1}]   ;;  %s523_s4 = inlined_call_operand.vmem [shape: f32[1,128], index: 4, kind: output, shape index: {2}]   ;;  %s524_s2 = inlined_call_operand.vmem [shape: f32[128,128], index: 2, kind: output, shape index: {0}]  }
   0x1   :  { %v376_v0 = vld [vmem:[%s520_s1] sm:$0xff]   ;;  %v377_v1 = vld [vmem:[%s520_s1 + $0x8] sm:$0xff]   ;;  %v378_v2 = vld [vmem:[%s520_s1 + $0x10] ss:$0 sps:$4 sm:$0x33]   ;;  %237 = vst [vmem:[%s522_s3] sm:$0x1] %v387_v12 }
   0x2   :  { %345 = vmatprep.subr.bf16.mxu0 %v376_v0  ;;  %v379_v3 = vld [vmem:[%s521_s0] sm:$0xff]   ;;  %367 = vmatprep.subr.bf16.mxu1 %v376_v0  ;;  %v118_v5 = vsel %vm116_vm1, %v378_v2, 0  ;;  %v380_v6 = vld [vmem:[%s521_s0 + $0x8] sm:$0xff]   ;;  %v381_v8 = vld [vmem:[%s521_s0 + $0x10] sm:$0xff]   ;;  %238 = vst [vmem:[%s523_s4] sm:$0x1] %v387_v12 }
   0x3   :  { %346 = vmatpush3.bf16.msra.mxu0 %v376_v0  ;;  %370 = vmatpush3.bf16.msra.mxu1 %v376_v0  ;;  %v383_v4 = vld [vmem:[%s521_s0 + $0x20] sm:$0xff]   ;;  %v384_v7 = vld [vmem:[%s521_s0 + $0x28] sm:$0xff]   ;;  %v385_v9 = vld [vmem:[%s521_s0 + $0x30] sm:$0xff]  }
   0x4   :  { %347 = vmatprep.subr.bf16.mxu0 %v377_v1  ;;  %351 = vmatprep.mubr.msk.bf16.mxu0 %vm91_vm0, %v379_v3  ;;  %v382_v10 = vld [vmem:[%s521_s0 + $0x18] sm:$0xff]  }
   0x5   :  { %368 = vmatprep.subr.bf16.mxu1 %v377_v1  ;;  %359 = vmatprep.mubr.msk.bf16.mxu1 %vm91_vm0, %v383_v4  ;;  %v386_v11 = vld [vmem:[%s521_s0 + $0x38] sm:$0xff]  }
   0x7   :  { %348 = vmatpush3.bf16.msra.mxu0 %v377_v1  ;;  %371 = vmatpush3.bf16.msra.mxu1 %v377_v1 }
   0x8   :  { %373 = vmatprep.subr.msk.bf16.mxu0 %vm116_vm1, %v378_v2  ;;  %374 = vmatprep.subr.msk.bf16.mxu1 %vm116_vm1, %v378_v2 }
   0xb   :  { %350 = vmatpush3.bf16.msra.mxu0 %v118_v5  ;;  %372 = vmatpush3.bf16.msra.mxu1 %v118_v5 }
   0xe   :  { %352 = vmatmul.mubr.msk.bf16.vlgmr.msra.gmra.mrb[0].mxu0 %vm91_vm0, %v380_v6  ;;  %360 = vmatmul.mubr.msk.bf16.vlgmr.msra.gmra.mrb[0].mxu1 %vm91_vm0, %v384_v7 }
   0xf   :  { %355 = vmatprep.mubr.msk.bf16.mxu0 %vm91_vm0, %v381_v8  ;;  %363 = vmatprep.mubr.msk.bf16.mxu1 %vm91_vm0, %v385_v9 }
  0x16   :  { %356 = vmatmul.mubr.msk.bf16.gmra.mrb[4].mxu0 %vm91_vm0, %v382_v10  ;;  %364 = vmatmul.mubr.msk.bf16.gmra.mrb[4].mxu1 %vm91_vm0, %v386_v11 }
  0xe1   :  { %v353_v13 = vpop.f32.mrb[0].mxu0  ;;  %v361_v14 = vpop.f32.mrb[0].mxu1 }
  0xe2   :  { %219 = vst [vmem:[%s524_s2 + $0x10] sm:$0xff] %v353_v13  ;;  %v154_v15 = vpop.f32.mrb[1].mxu0  ;;  %227 = vst [vmem:[%s524_s2 + $0x50] sm:$0xff] %v361_v14  ;;  %v186_v16 = vpop.f32.mrb[1].mxu1  ;;  %v266_v24 = vmul.f32 %v353_v13, %v353_v13  ;;  %v274_v56 = vmul.f32 %v361_v14, %v361_v14 }
  0xe3   :  { %217 = vst [vmem:[%s524_s2] sm:$0xff] %v154_v15  ;;  %v354_v17 = vpop.f32.mrb[2].mxu0  ;;  %225 = vst [vmem:[%s524_s2 + $0x40] sm:$0xff] %v186_v16  ;;  %v362_v18 = vpop.f32.mrb[2].mxu1  ;;  %v264_v21 = vmul.f32 %v154_v15, %v154_v15  ;;  %v272_v50 = vmul.f32 %v186_v16, %v186_v16 }
  0xe4   :  { %220 = vst [vmem:[%s524_s2 + $0x18] sm:$0xff] %v354_v17  ;;  %v157_v19 = vpop.f32.mrb[3].mxu0  ;;  %228 = vst [vmem:[%s524_s2 + $0x58] sm:$0xff] %v362_v18  ;;  %v189_v20 = vpop.f32.mrb[3].mxu1  ;;  %v267_v27 = vmul.f32 %v354_v17, %v354_v17  ;;  %v275_v59 = vmul.f32 %v362_v18, %v362_v18 }
  0xe5   :  { %218 = vst [vmem:[%s524_s2 + $0x8] sm:$0xff] %v157_v19  ;;  %v240_v22 = vadd.f32 %v157_v19, %v154_v15  ;;  %v265_v23 = vmul.f32 %v157_v19, %v157_v19  ;;  %226 = vst [vmem:[%s524_s2 + $0x48] sm:$0xff] %v189_v20  ;;  %v273_v55 = vmul.f32 %v189_v20, %v189_v20 }
  0xe7   :  { %v241_v25 = vadd.f32 %v353_v13, %v240_v22  ;;  %v280_v26 = vadd.f32 %v265_v23, %v264_v21  ;;  %v263_v23 = vld [vmem:[%s523_s4] sm:$0x1] }
  0xe9   :  { %v281_v28 = vadd.f32 %v280_v26, %v266_v24  ;;  %v357_v29 = vpop.f32.mrb[4].mxu0  ;;  %v242_v30 = vadd.f32 %v354_v17, %v241_v25  ;;  %v365_v31 = vpop.f32.mrb[4].mxu1 }
  0xea   :  { %223 = vst [vmem:[%s524_s2 + $0x30] sm:$0xff] %v357_v29  ;;  %v170_v32 = vpop.f32.mrb[5].mxu0  ;;  %231 = vst [vmem:[%s524_s2 + $0x70] sm:$0xff] %v365_v31  ;;  %v202_v33 = vpop.f32.mrb[5].mxu1  ;;  %v270_v44 = vmul.f32 %v357_v29, %v357_v29  ;;  %v278_v4 = vmul.f32 %v365_v31, %v365_v31 }
  0xeb   :  { %221 = vst [vmem:[%s524_s2 + $0x20] sm:$0xff] %v170_v32  ;;  %v243_v34 = vadd.f32 %v242_v30, %v170_v32  ;;  %v268_v35 = vmul.f32 %v170_v32, %v170_v32  ;;  %v282_v36 = vadd.f32 %v281_v28, %v267_v27  ;;  %v358_v37 = vpop.f32.mrb[6].mxu0  ;;  %229 = vst [vmem:[%s524_s2 + $0x60] sm:$0xff] %v202_v33  ;;  %v366_v38 = vpop.f32.mrb[6].mxu1 }
  0xec   :  { %224 = vst [vmem:[%s524_s2 + $0x38] sm:$0xff] %v358_v37  ;;  %v173_v39 = vpop.f32.mrb[7].mxu0  ;;  %232 = vst [vmem:[%s524_s2 + $0x78] sm:$0xff] %v366_v38  ;;  %v205_v40 = vpop.f32.mrb[7].mxu1  ;;  %v271_v47 = vmul.f32 %v358_v37, %v358_v37  ;;  %v276_v62 = vmul.f32 %v202_v33, %v202_v33  ;;  %v279_v7 = vmul.f32 %v366_v38, %v366_v38 }
  0xed   :  { %v283_v41 = vadd.f32 %v282_v36, %v268_v35  ;;  %222 = vst [vmem:[%s524_s2 + $0x28] sm:$0xff] %v173_v39  ;;  %v244_v42 = vadd.f32 %v243_v34, %v173_v39  ;;  %v269_v43 = vmul.f32 %v173_v39, %v173_v39  ;;  %230 = vst [vmem:[%s524_s2 + $0x68] sm:$0xff] %v205_v40 }
  0xee   :  { %v277_v3 = vmul.f32 %v205_v40, %v205_v40 }
  0xef   :  { %v245_v45 = vadd.f32 %v357_v29, %v244_v42  ;;  %v284_v46 = vadd.f32 %v283_v41, %v269_v43 }
  0xf1   :  { %v285_v48 = vadd.f32 %v284_v46, %v270_v44  ;;  %v246_v49 = vadd.f32 %v358_v37, %v245_v45 }
  0xf3   :  { %v247_v51 = vadd.f32 %v246_v49, %v186_v16  ;;  %v286_v52 = vadd.f32 %v285_v48, %v271_v47 }
  0xf5   :  { %v287_v53 = vadd.f32 %v286_v52, %v272_v50  ;;  %v248_v54 = vadd.f32 %v247_v51, %v189_v20  ;;  %v239_v20 = vld [vmem:[%s522_s3] sm:$0x1] }
  0xf7   :  { %v249_v57 = vadd.f32 %v361_v14, %v248_v54  ;;  %v288_v58 = vadd.f32 %v287_v53, %v273_v55 }
  0xf9   :  { %v289_v60 = vadd.f32 %v288_v58, %v274_v56  ;;  %v250_v61 = vadd.f32 %v362_v18, %v249_v57 }
  0xfb   :  { %v251_v63 = vadd.f32 %v250_v61, %v202_v33  ;;  %v290_v0 = vadd.f32 %v289_v60, %v275_v59 }
  0xfd   :  { %v291_v1 = vadd.f32 %v290_v0, %v276_v62  ;;  %v252_v2 = vadd.f32 %v251_v63, %v205_v40 }
  0xff   :  { %v253_v5 = vadd.f32 %v365_v31, %v252_v2  ;;  %v292_v6 = vadd.f32 %v291_v1, %v277_v3 }
 0x101   :  { %v254_v8 = vadd.f32 %v366_v38, %v253_v5  ;;  %v293_v9 = vadd.f32 %v292_v6, %v278_v4 }
 0x103   :  { %v255_v10 = vrot.slane %v254_v8, 4  ;;  %v294_v11 = vadd.f32 %v293_v9, %v279_v7 }
 0x105   :  { %v256_v12 = vadd.f32 %v255_v10, %v254_v8  ;;  %v295_v13 = vrot.slane %v294_v11, 4 }
 0x107   :  { %v257_v14 = vrot.slane %v256_v12, 2  ;;  %v296_v15 = vadd.f32 %v295_v13, %v294_v11 }
 0x109   :  { %v258_v16 = vadd.f32 %v257_v14, %v256_v12  ;;  %v297_v17 = vrot.slane %v296_v15, 2 }
 0x10b   :  { %v259_v18 = vrot.slane %v258_v16, 1  ;;  %v298_v19 = vadd.f32 %v297_v17, %v296_v15 }
 0x10d   :  { %v260_v21 = vadd.f32 %v259_v18, %v258_v16  ;;  %v299_v22 = vrot.slane %v298_v19, 1 }
 0x10f   :  { %v261_v24 = vadd.f32 %v260_v21, %v239_v20  ;;  %v300_v25 = vadd.f32 %v299_v22, %v298_v19 }
 0x111   :  { %262 = vst [vmem:[%s522_s3] sm:$0x1] %v261_v24  ;;  %v301_v26 = vadd.f32 %v300_v25, %v263_v23 }
 0x113   :  { %302 = vst [vmem:[%s523_s4] sm:$0x1] %v301_v26 }

// kernel: residual_block2_pallas.8
= control target key start
LH: loop header
LB: loop body
LE: loop exit
PB: predicated region body
PF: predicated region fallthrough
CT: control target
= control target key end

     0   :  { %s391_s0 = inlined_call_operand.vmem [shape: f32[128,128], index: 0, kind: input, shape index: {}]   ;;  %s392_s1 = inlined_call_operand.vmem [shape: f32[1,128], index: 1, kind: input, shape index: {}]   ;;  %s393_s2 = inlined_call_operand.vmem [shape: f32[1,128], index: 2, kind: input, shape index: {}]   ;;  %s394_s3 = inlined_call_operand.vmem [shape: bf16[128,128], index: 3, kind: output, shape index: {}]  }
   0x1   :  { %v14_v0 = vld [vmem:[%s391_s0] sm:$0xff]  ;;  %v15_v1 = vld [vmem:[%s391_s0 + $0x8] sm:$0xff]  ;;  %v16_v6 = vld [vmem:[%s391_s0 + $0x10] sm:$0xff] }
   0x2   :  { %v286_v2 = vld [vmem:[%s392_s1] ss:$0 sm:$0xff]  ;;  %v17_v7 = vld [vmem:[%s391_s0 + $0x18] sm:$0xff]  ;;  %v19_v11 = vld [vmem:[%s391_s0 + $0x28] sm:$0xff] }
   0x3   :  { %v37_v3 = vmul.f32 %v286_v2, %v14_v0  ;;  %v38_v4 = vmul.f32 %v286_v2, %v15_v1  ;;  %v293_v5 = vld [vmem:[%s393_s2] ss:$0 sm:$0xff]  ;;  %v39_v8 = vmul.f32 %v286_v2, %v16_v6  ;;  %v40_v9 = vmul.f32 %v286_v2, %v17_v7  ;;  %v20_v12 = vld [vmem:[%s391_s0 + $0x30] sm:$0xff]  ;;  %v21_v17 = vld [vmem:[%s391_s0 + $0x38] sm:$0xff] }
   0x4   :  { %v18_v10 = vld [vmem:[%s391_s0 + $0x20] sm:$0xff]  ;;  %v42_v16 = vmul.f32 %v286_v2, %v19_v11  ;;  %v43_v20 = vmul.f32 %v286_v2, %v20_v12  ;;  %v44_v21 = vmul.f32 %v286_v2, %v21_v17  ;;  %v23_v27 = vld [vmem:[%s391_s0 + $0x48] sm:$0xff]  ;;  %v24_v32 = vld [vmem:[%s391_s0 + $0x50] sm:$0xff] }
   0x5   :  { %v60_v13 = vadd.f32 %v293_v5, %v37_v3  ;;  %v61_v14 = vadd.f32 %v293_v5, %v38_v4  ;;  %v41_v15 = vmul.f32 %v286_v2, %v18_v10  ;;  %v62_v18 = vadd.f32 %v293_v5, %v39_v8  ;;  %v22_v22 = vld [vmem:[%s391_s0 + $0x40] sm:$0xff]  ;;  %v25_v33 = vld [vmem:[%s391_s0 + $0x58] sm:$0xff]  ;;  %v27_v39 = vld [vmem:[%s391_s0 + $0x68] sm:$0xff] }
   0x6   :  { %v63_v19 = vadd.f32 %v293_v5, %v40_v9  ;;  %v65_v26 = vadd.f32 %v293_v5, %v42_v16  ;;  %v66_v30 = vadd.f32 %v293_v5, %v43_v20  ;;  %v67_v31 = vadd.f32 %v293_v5, %v44_v21  ;;  %v26_v38 = vld [vmem:[%s391_s0 + $0x60] sm:$0xff]  ;;  %v28_v44 = vld [vmem:[%s391_s0 + $0x70] sm:$0xff]  ;;  %v29_v49 = vld [vmem:[%s391_s0 + $0x78] sm:$0xff] }
   0x7   :  { %v76_v23 = vmax.f32 %v60_v13, 0.0  ;;  %v77_v24 = vmax.f32 %v61_v14, 0.0  ;;  %v64_v25 = vadd.f32 %v293_v5, %v41_v15  ;;  %v78_v28 = vmax.f32 %v62_v18, 0.0 }
   0x8   :  { %v79_v29 = vmax.f32 %v63_v19, 0.0  ;;  %v81_v36 = vmax.f32 %v65_v26, 0.0  ;;  %v45_v37 = vmul.f32 %v286_v2, %v22_v22  ;;  %v82_v41 = vmax.f32 %v66_v30, 0.0 }
   0x9   :  { %v213_v34 = vpack.c.bf16 %v77_v24, %v76_v23  ;;  %v80_v35 = vmax.f32 %v64_v25, 0.0  ;;  %v83_v42 = vmax.f32 %v67_v31, 0.0  ;;  %v46_v43 = vmul.f32 %v286_v2, %v23_v27 }
   0xa   :  { %v218_v40 = vpack.c.bf16 %v79_v29, %v78_v28  ;;  %v68_v46 = vadd.f32 %v293_v5, %v45_v37  ;;  %v47_v47 = vmul.f32 %v286_v2, %v24_v32  ;;  %v48_v48 = vmul.f32 %v286_v2, %v25_v33 }
   0xb   :  { %214 = vst [vmem:[%s394_s3] sm:$0xff] %v213_v34   ;;  %v223_v45 = vpack.c.bf16 %v81_v36, %v80_v35  ;;  %v228_v50 = vpack.c.bf16 %v83_v42, %v82_v41  ;;  %v69_v51 = vadd.f32 %v293_v5, %v46_v43  ;;  %v49_v52 = vmul.f32 %v286_v2, %v26_v38 }
   0xc   :  { %250 = vst [vmem:[%s394_s3 + $0x8] sm:$0xff] %v218_v40   ;;  %v50_v53 = vmul.f32 %v286_v2, %v27_v39  ;;  %v84_v54 = vmax.f32 %v68_v46, 0.0  ;;  %v70_v55 = vadd.f32 %v293_v5, %v47_v47  ;;  %v71_v56 = vadd.f32 %v293_v5, %v48_v48 }
   0xd   :  { %251 = vst [vmem:[%s394_s3 + $0x10] sm:$0xff] %v223_v45   ;;  %v51_v57 = vmul.f32 %v286_v2, %v28_v44  ;;  %252 = vst [vmem:[%s394_s3 + $0x18] sm:$0xff] %v228_v50   ;;  %v85_v58 = vmax.f32 %v69_v51, 0.0  ;;  %v72_v59 = vadd.f32 %v293_v5, %v49_v52  ;;  %v52_v61 = vmul.f32 %v286_v2, %v29_v49 }
   0xe   :  { %v73_v60 = vadd.f32 %v293_v5, %v50_v53  ;;  %v86_v62 = vmax.f32 %v70_v55, 0.0  ;;  %v87_v63 = vmax.f32 %v71_v56, 0.0 }
   0xf   :  { %v74_v0 = vadd.f32 %v293_v5, %v51_v57  ;;  %v233_v1 = vpack.c.bf16 %v85_v58, %v84_v54  ;;  %v88_v3 = vmax.f32 %v72_v59, 0.0  ;;  %v75_v6 = vadd.f32 %v293_v5, %v52_v61 }
  0x10   :  { %v89_v4 = vmax.f32 %v73_v60, 0.0  ;;  %v238_v7 = vpack.c.bf16 %v87_v63, %v86_v62 }
  0x11   :  { %v90_v8 = vmax.f32 %v74_v0, 0.0  ;;  %253 = vst [vmem:[%s394_s3 + $0x20] sm:$0xff] %v233_v1   ;;  %v91_v10 = vmax.f32 %v75_v6, 0.0 }
  0x12   :  { %v243_v9 = vpack.c.bf16 %v89_v4, %v88_v3  ;;  %254 = vst [vmem:[%s394_s3 + $0x28] sm:$0xff] %v238_v7  }
  0x13   :  { %v248_v2 = vpack.c.bf16 %v91_v10, %v90_v8 }
  0x14   :  { %255 = vst [vmem:[%s394_s3 + $0x30] sm:$0xff] %v243_v9  }
  0x15   :  { %256 = vst [vmem:[%s394_s3 + $0x38] sm:$0xff] %v248_v2  }

// kernel: residual_block2_pallas.9
= control target key start
LH: loop header
LB: loop body
LE: loop exit
PB: predicated region body
PF: predicated region fallthrough
CT: control target
= control target key end

     0   :  { %vm128_vm0 = vcmask 1041408   ;;  %vm103_vm1 = vcmask 31744   ;;  %vm296_vm2 = vcmask 588800   ;;  %vm321_vm3 = vcmask 1043456   ;;  %s800_s3 = inlined_call_operand.vmem [shape: bf16[4,128], index: 3, kind: input, shape index: {}]   ;;  %s801_s1 = inlined_call_operand.vmem [shape: bf16[72,128], index: 1, kind: input, shape index: {}]   ;;  %s802_s2 = inlined_call_operand.vmem [shape: bf16[128,4], index: 2, kind: input, shape index: {}]   ;;  %s803_s0 = inlined_call_operand.vmem [shape: bf16[128,72], index: 0, kind: input, shape index: {}]   ;;  %s804_s4 = inlined_call_operand.vmem [shape: f32[1,128], index: 4, kind: input, shape index: {}]   ;;  %s805_s5 = inlined_call_operand.vmem [shape: f32[128,128], index: 5, kind: output, shape index: {}]  }
   0x1   :  { %v62_v0 = vld [vmem:[%s800_s3] sm:$0x3]  ;;  %v600_v4 = vld [vmem:[%s802_s2 + $0x8] sm:$0xff]   ;;  %v602_v6 = vld [vmem:[%s801_s1 + $0x10] sm:$0xff]  }
   0x2   :  { %595 = vmatprep.subr.msk.bf16.mxu0 %vm128_vm0, %v62_v0  ;;  %v130_v1 = vsel %vm128_vm0, %v62_v0, 0  ;;  %v598_v2 = vld [vmem:[%s801_s1] sm:$0xff]   ;;  %v601_v5 = vld [vmem:[%s801_s1 + $0x8] sm:$0xff]   ;;  %v603_v7 = vld [vmem:[%s802_s2 + $0x10] sm:$0xff]  }
   0x3   :  { %526 = vmatpush3.bf16.msra.mxu0 %v130_v1  ;;  %v599_v3 = vld [vmem:[%s802_s2] sm:$0xff]   ;;  %569 = vmatprep.subr.bf16.mxu1 %v598_v2  ;;  %v604_v8 = vld [vmem:[%s802_s2 + $0x18] sm:$0xff]   ;;  %v609_v11 = vld [vmem:[%s803_s0 + $0x10] sm:$0xff]  }
   0x4   :  { %543 = vmatprep.subr.bf16.mxu0 %v598_v2  ;;  %527 = vmatprep.mubr.msk.bf16.mxu0 %vm103_vm1, %v599_v3  ;;  %v605_v9 = vld [vmem:[%s801_s1 + $0x18] sm:$0xff]   ;;  %v607_v10 = vld [vmem:[%s802_s2 + $0x20] sm:$0xff]   ;;  %v608_v14 = vld [vmem:[%s802_s2 + $0x28] sm:$0xff]  }
   0x5   :  { %574 = vmatpush3.bf16.msra.mxu1 %v598_v2  ;;  %v606_v12 = vld [vmem:[%s801_s1 + $0x20] ss:$0 sps:$4 sm:$0xff]   ;;  %557 = vmatprep.mubr.msk.bf16.mxu1 %vm296_vm2, %v609_v11  ;;  %v611_v15 = vld [vmem:[%s802_s2 + $0x30] sm:$0xff]   ;;  %v610_v16 = vld [vmem:[%s803_s0 + $0x18] sm:$0xff]  }
   0x6   :  { %528 = vmatmul.mubr.msk.bf16.vlgmr.msra.gmra.mrb[0].mxu0 %vm103_vm1, %v600_v4  ;;  %570 = vmatprep.subr.bf16.mxu1 %v601_v5  ;;  %v323_v13 = vsel %vm321_vm3, %v606_v12, 0  ;;  %v613_v17 = vld [vmem:[%s803_s0 + $0x20] sm:$0xff]   ;;  %v612_v18 = vld [vmem:[%s802_s2 + $0x38] sm:$0xff]   ;;  %v614_v20 = vld [vmem:[%s803_s0 + $0x28] sm:$0xff]  }
   0x7   :  { %544 = vmatpush3.bf16.msra.mxu0 %v598_v2  ;;  %531 = vmatprep.mubr.msk.bf16.mxu0 %vm103_vm1, %v603_v7  ;;  %v615_v19 = vld [vmem:[%s803_s0] sm:$0xff]   ;;  %v617_v21 = vld [vmem:[%s803_s0 + $0x30] sm:$0xff]   ;;  %v616_v22 = vld [vmem:[%s803_s0 + $0x8] sm:$0xff]  }
   0x8   :  { %545 = vmatprep.subr.bf16.mxu0 %v601_v5  ;;  %v618_v23 = vld [vmem:[%s803_s0 + $0x38] sm:$0xff]   ;;  %v734_v31 = vld [vmem:[%s804_s4] ss:$0 sm:$0xff] }
   0x9   :  { %575 = vmatpush3.bf16.msra.mxu1 %v601_v5 }
   0xa   :  { %571 = vmatprep.subr.bf16.mxu1 %v602_v6 }
   0xb   :  { %546 = vmatpush3.bf16.msra.mxu0 %v601_v5 }
   0xc   :  { %547 = vmatprep.subr.bf16.mxu0 %v602_v6 }
   0xd   :  { %576 = vmatpush3.bf16.msra.mxu1 %v602_v6 }
   0xe   :  { %532 = vmatmul.mubr.msk.bf16.gmra.mrb[4].mxu0 %vm103_vm1, %v604_v8  ;;  %572 = vmatprep.subr.bf16.mxu1 %v605_v9 }
   0xf   :  { %535 = vmatprep.mubr.msk.bf16.mxu0 %vm103_vm1, %v607_v10  ;;  %548 = vmatpush3.bf16.msra.mxu0 %v602_v6 }
  0x10   :  { %549 = vmatprep.subr.bf16.mxu0 %v605_v9 }
  0x11   :  { %577 = vmatpush3.bf16.msra.mxu1 %v605_v9 }
  0x12   :  { %597 = vmatprep.subr.msk.bf16.mxu1 %vm321_vm3, %v606_v12 }
  0x13   :  { %550 = vmatpush3.bf16.msra.mxu0 %v605_v9 }
  0x14   :  { %596 = vmatprep.subr.msk.bf16.mxu0 %vm321_vm3, %v606_v12 }
  0x15   :  { %578 = vmatpush3.bf16.msra.mxu1 %v323_v13 }
  0x16   :  { %536 = vmatmul.mubr.msk.bf16.gmra.mrb[8].mxu0 %vm103_vm1, %v608_v14 }
  0x17   :  { %539 = vmatprep.mubr.msk.bf16.mxu0 %vm103_vm1, %v611_v15  ;;  %552 = vmatpush3.bf16.msra.mxu0 %v323_v13 }
  0x18   :  { %558 = vmatmul.mubr.msk.bf16.vlgmr.msra.gmra.mrb[0].mxu1 %vm296_vm2, %v610_v16 }
  0x19   :  { %561 = vmatprep.mubr.msk.bf16.mxu1 %vm296_vm2, %v613_v17 }
  0x1e   :  { %540 = vmatmul.mubr.msk.bf16.gmra.mrb[12].mxu0 %vm103_vm1, %v612_v18 }
  0x1f   :  { %553 = vmatprep.mubr.msk.bf16.mxu0 %vm296_vm2, %v615_v19 }
  0x20   :  { %562 = vmatmul.mubr.msk.bf16.gmra.mrb[4].mxu1 %vm296_vm2, %v614_v20 }
  0x21   :  { %565 = vmatprep.mubr.msk.bf16.mxu1 %vm296_vm2, %v617_v21 }
  0x26   :  { %554 = vmatmul.mubr.msk.bf16.vlgmr.msra.gmra.mrb[0].mxu0 %vm296_vm2, %v616_v22 }
  0x28   :  { %566 = vmatmul.mubr.msk.bf16.gmra.mrb[8].mxu1 %vm296_vm2, %v618_v23 }
  0xe1   :  { %v533_v24 = vpop.f32.mrb[4].mxu0 }
  0xe2   :  { %v182_v25 = vpop.f32.mrb[5].mxu0 }
  0xe3   :  { %v534_v26 = vpop.f32.mrb[6].mxu0 }
  0xe4   :  { %v185_v27 = vpop.f32.mrb[7].mxu0 }
  0xe9   :  { %v537_v28 = vpop.f32.mrb[8].mxu0 }
  0xea   :  { %v198_v29 = vpop.f32.mrb[9].mxu0 }
  0xeb   :  { %v559_v30 = vpop.f32.mrb[0].mxu1  ;;  %v538_v32 = vpop.f32.mrb[10].mxu0 }
  0xec   :  { %v384_v33 = vadd.f32 %v559_v30, %v533_v24  ;;  %v375_v34 = vpop.f32.mrb[1].mxu1  ;;  %v201_v35 = vpop.f32.mrb[11].mxu0 }
  0xed   :  { %v376_v36 = vadd.f32 %v375_v34, %v182_v25  ;;  %v560_v37 = vpop.f32.mrb[2].mxu1 }
  0xee   :  { %v435_v38 = vadd.f32 %v734_v31, %v384_v33  ;;  %v387_v39 = vadd.f32 %v560_v37, %v534_v26  ;;  %v378_v40 = vpop.f32.mrb[3].mxu1 }
  0xef   :  { %v433_v41 = vadd.f32 %v734_v31, %v376_v36  ;;  %v379_v42 = vadd.f32 %v378_v40, %v185_v27 }
  0xf0   :  { %451 = vst [vmem:[%s805_s5 + $0x30] sm:$0xff] %v435_v38  ;;  %v436_v43 = vadd.f32 %v734_v31, %v387_v39 }
  0xf1   :  { %449 = vst [vmem:[%s805_s5 + $0x20] sm:$0xff] %v433_v41  ;;  %v434_v44 = vadd.f32 %v734_v31, %v379_v42  ;;  %v541_v45 = vpop.f32.mrb[12].mxu0 }
  0xf2   :  { %452 = vst [vmem:[%s805_s5 + $0x38] sm:$0xff] %v436_v43  ;;  %v214_v46 = vpop.f32.mrb[13].mxu0 }
  0xf3   :  { %450 = vst [vmem:[%s805_s5 + $0x28] sm:$0xff] %v434_v44  ;;  %v563_v47 = vpop.f32.mrb[4].mxu1  ;;  %v542_v48 = vpop.f32.mrb[14].mxu0 }
  0xf4   :  { %v400_v49 = vadd.f32 %v563_v47, %v537_v28  ;;  %v391_v50 = vpop.f32.mrb[5].mxu1  ;;  %v217_v51 = vpop.f32.mrb[15].mxu0 }
  0xf5   :  { %v392_v52 = vadd.f32 %v391_v50, %v198_v29  ;;  %v564_v53 = vpop.f32.mrb[6].mxu1 }
  0xf6   :  { %v439_v54 = vadd.f32 %v734_v31, %v400_v49  ;;  %v403_v55 = vadd.f32 %v564_v53, %v538_v32  ;;  %v394_v56 = vpop.f32.mrb[7].mxu1 }
  0xf7   :  { %v437_v57 = vadd.f32 %v734_v31, %v392_v52  ;;  %v395_v58 = vadd.f32 %v394_v56, %v201_v35 }
  0xf8   :  { %455 = vst [vmem:[%s805_s5 + $0x50] sm:$0xff] %v439_v54  ;;  %v440_v59 = vadd.f32 %v734_v31, %v403_v55 }
  0xf9   :  { %453 = vst [vmem:[%s805_s5 + $0x40] sm:$0xff] %v437_v57  ;;  %v438_v60 = vadd.f32 %v734_v31, %v395_v58  ;;  %v555_v61 = vpop.f32.mrb[0].mxu0 }
  0xfa   :  { %456 = vst [vmem:[%s805_s5 + $0x58] sm:$0xff] %v440_v59  ;;  %v431_v62 = vadd.f32 %v555_v61, %v734_v31  ;;  %v359_v63 = vpop.f32.mrb[1].mxu0 }
  0xfb   :  { %454 = vst [vmem:[%s805_s5 + $0x48] sm:$0xff] %v438_v60  ;;  %v429_v0 = vadd.f32 %v734_v31, %v359_v63  ;;  %v556_v1 = vpop.f32.mrb[2].mxu0  ;;  %v567_v2 = vpop.f32.mrb[8].mxu1 }
  0xfc   :  { %447 = vst [vmem:[%s805_s5 + $0x10] sm:$0xff] %v431_v62  ;;  %v432_v3 = vadd.f32 %v556_v1, %v734_v31  ;;  %v416_v4 = vadd.f32 %v567_v2, %v541_v45  ;;  %v362_v5 = vpop.f32.mrb[3].mxu0  ;;  %v407_v6 = vpop.f32.mrb[9].mxu1 }
  0xfd   :  { %445 = vst [vmem:[%s805_s5] sm:$0xff] %v429_v0  ;;  %v430_v7 = vadd.f32 %v734_v31, %v362_v5  ;;  %v408_v8 = vadd.f32 %v407_v6, %v214_v46  ;;  %v568_v9 = vpop.f32.mrb[10].mxu1 }
  0xfe   :  { %448 = vst [vmem:[%s805_s5 + $0x18] sm:$0xff] %v432_v3  ;;  %v443_v10 = vadd.f32 %v734_v31, %v416_v4  ;;  %v419_v11 = vadd.f32 %v568_v9, %v542_v48  ;;  %v410_v12 = vpop.f32.mrb[11].mxu1 }
  0xff   :  { %446 = vst [vmem:[%s805_s5 + $0x8] sm:$0xff] %v430_v7  ;;  %v441_v13 = vadd.f32 %v734_v31, %v408_v8  ;;  %v411_v14 = vadd.f32 %v410_v12, %v217_v51 }
 0x100   :  { %459 = vst [vmem:[%s805_s5 + $0x70] sm:$0xff] %v443_v10  ;;  %v444_v15 = vadd.f32 %v734_v31, %v419_v11 }
 0x101   :  { %457 = vst [vmem:[%s805_s5 + $0x60] sm:$0xff] %v441_v13  ;;  %v442_v16 = vadd.f32 %v734_v31, %v411_v14 }
 0x102   :  { %460 = vst [vmem:[%s805_s5 + $0x78] sm:$0xff] %v444_v15 }
 0x103   :  { %458 = vst [vmem:[%s805_s5 + $0x68] sm:$0xff] %v442_v16 }

</bundles_post_ra>
